<compile_context>
chip_gen: v7x
topology: tpu7x:2x2x1
jax: 0.10.0
libtpu: 0.0.40
codegen_flags: <defaults>
</compile_context>

<pallas_src>
import math

import jax
import jax.numpy as jnp
from jax import lax
from jax.experimental import pallas as pl
from jax.experimental.pallas import tpu as pltpu

_LANE = 128


def _attention_kernel(xk_ref, xq_ref, wq_ref, bq_ref, wkv_ref, bkv_ref, o_ref):
    bt, sq, cin = xq_ref.shape
    _, sk, _ = xk_ref.shape
    cp = wq_ref.shape[-1]
    bf16 = jnp.bfloat16

    # bf16 MXU operands; f32 accumulation everywhere (preferred_element_type).
    xq = xq_ref[...].astype(bf16)      # (Bt, Sq, Cin)
    xk = xk_ref[...].astype(bf16)      # (Bt, Sk, Cin)
    wq = wq_ref[...]                   # (Cin, Cp)   bf16, 1/sqrt(d_k) folded in
    wkv = wkv_ref[...]                 # (Cin, 2*Cp) bf16, fused K | V
    bq = bq_ref[...]                   # (1, Cp)     f32
    bkv = bkv_ref[...]                 # (1, 2*Cp)   f32

    # Projections: flatten the batch dim so each projection is one big MXU
    # matmul (M = Bt*S) instead of Bt tiny batched matmuls.  The reshape is
    # layout-free when S is a multiple of 8 (sublane); otherwise fall back to
    # the batched dot_general.
    if sq % 8 == 0:
        query = (jnp.dot(xq.reshape(bt * sq, cin), wq,
                         preferred_element_type=jnp.float32) + bq
                 ).reshape(bt, sq, cp)
    else:
        query = lax.dot_general(xq, wq, (((2,), (0,)), ((), ())),
                                preferred_element_type=jnp.float32) + bq
    if sk % 8 == 0:
        kv = (jnp.dot(xk.reshape(bt * sk, cin), wkv,
                      preferred_element_type=jnp.float32) + bkv
              ).reshape(bt, sk, 2 * cp)
    else:
        kv = lax.dot_general(xk, wkv, (((2,), (0,)), ((), ())),
                             preferred_element_type=jnp.float32) + bkv
    key = kv[:, :, :cp]                # (Bt, Sk, Cp)   (lane-tile-aligned slice)
    value = kv[:, :, cp:]              # (Bt, Sk, Cp)

    # scores = (Q / sqrt(d_k)) K^T — contract the last dims (no XLU transpose).
    scores = lax.dot_general(query.astype(bf16), key.astype(bf16),
                             (((2,), (2,)), ((0,), (0,))),
                             preferred_element_type=jnp.float32)   # (Bt, Sq, Sk)

    # Numerically stable softmax in f32; normalization is applied AFTER the PV
    # matmul (scales (Sq, Cp) instead of (Sq, Sk)).
    m = jnp.max(scores, axis=-1, keepdims=True)
    e = jnp.exp(scores - m)
    denom = jnp.sum(e, axis=-1, keepdims=True)

    out = lax.dot_general(e.astype(bf16), value.astype(bf16),
                          (((2,), (1,)), ((0,), (0,))),
                          preferred_element_type=jnp.float32)      # (Bt, Sq, Cp)
    out = out * pl.reciprocal(denom, approx=True)
    o_ref[...] = out.astype(o_ref.dtype)


def _round_up(x, m):
    return ((x + m - 1) // m) * m


def _largest_divisor_leq(n, cap):
    for d in range(min(n, cap), 0, -1):
        if n % d == 0:
            return d
    return 1


def _vmem_limit_bytes():
    """Pick a scoped-VMEM limit with headroom on every TPU generation."""
    limit = 48 * 1024 * 1024  # safe fallback (v7x only has 64 MiB physical)
    try:
        cap = int(pltpu.get_tpu_info().vmem_capacity_bytes)
        limit = min((cap * 3) // 4, 96 * 1024 * 1024)
    except Exception:
        pass
    return limit


def _choose_block_b(B, Sq, Sk, Cin, Cp, budget_bytes):
    """Largest batch tile that fits the VMEM budget, keeping >= 2 grid steps."""
    # Fixed footprint: weight/bias blocks (default double-buffered).
    fixed = 2 * ((Cin * Cp + Cin * 2 * Cp) * 2 + (Cp + 2 * Cp) * 4)
    # Per-batch-element footprint (bytes):
    per_b = (
        2 * (Sk + Sq) * Cin * 4                 # x_k / x_q blocks (double-buffered, f32)
        + 2 * Sq * Cp * 4                       # output block (double-buffered, f32)
        + (Sq * Cp + Sk * 2 * Cp) * 4           # f32 query / kv intermediates
        + 2 * Sq * Sk * 4                       # f32 scores + exp
        + Sq * Cp * 4                           # f32 PV accumulator
        + ((Sq + Sk) * Cin + Sq * Sk + Sk * Cp + Sq * Cp) * 2  # bf16 copies
    )
    avail = max(budget_bytes - fixed, per_b)
    max_b = max(1, int(avail // per_b))
    # Keep >= 2 grid steps so dimension_semantics=("parallel",) can shard the
    # batch axis across v7x's two TensorCores (no cost on single-TC v5e/v6e).
    cap = B if B == 1 else max(1, B // 2)
    return _largest_divisor_leq(B, min(cap, max_b))


def prepare_params(params, weight_dtype=jnp.bfloat16):
    """One-time host-side re-layout of the nn.Linear parameters.

    Pre-transposes to (Cin, Cout), folds 1/sqrt(d_k) into the Q projection,
    fuses K|V side by side, and zero-pads the feature dim to a multiple of 128
    lanes only when needed.  Call once at init — not every forward.
    """
    wk, bk = params["l_k"]
    wq, bq = params["l_q"]
    wv, bv = params["l_v"]
    Cout, Cin = wq.shape
    pad = (Cout % _LANE) != 0
    Cp = _round_up(Cout, _LANE) if pad else Cout
    scale = 1.0 / math.sqrt(Cout)    # d_k = out_channel

    f32 = jnp.float32
    wq_t = jnp.zeros((Cin, Cp), f32).at[:, :Cout].set(wq.T.astype(f32) * scale)
    bq_p = jnp.zeros((1, Cp), f32).at[:, :Cout].set(bq.astype(f32) * scale)
    wkv_t = (jnp.zeros((Cin, 2 * Cp), f32)
             .at[:, :Cout].set(wk.T.astype(f32))
             .at[:, Cp:Cp + Cout].set(wv.T.astype(f32)))
    bkv_p = (jnp.zeros((1, 2 * Cp), f32)
             .at[:, :Cout].set(bk.astype(f32))
             .at[:, Cp:Cp + Cout].set(bv.astype(f32)))
    return {
        "wq_t": wq_t.astype(weight_dtype),   # bf16 MXU operand
        "bq_p": bq_p,                        # f32 (added after the matmul)
        "wkv_t": wkv_t.astype(weight_dtype),
        "bkv_p": bkv_p,
        "out_channel": int(Cout),
        "padded": bool(pad),
    }


def attention_forward(x_k, x_q, prepped, block_b=None):
    """Pallas equivalent of attention.forward(x_k, x_q) (mask=None, dropout=None).

    x_k: (B, Sk, Cin), x_q: (B, Sq, Cin), prepped = prepare_params(...)
    -> (B, Sq, Cout)
    """
    B, Sk, Cin = x_k.shape
    _, Sq, _ = x_q.shape
    wq_t, bq_p = prepped["wq_t"], prepped["bq_p"]
    wkv_t, bkv_p = prepped["wkv_t"], prepped["bkv_p"]
    Cout = prepped["out_channel"]
    Cp = wq_t.shape[-1]

    vmem_limit = _vmem_limit_bytes()
    if block_b is None:
        block_b = _choose_block_b(B, Sq, Sk, Cin, Cp, (vmem_limit * 4) // 5)
    assert B % block_b == 0, "block_b must divide the batch size"
    grid = (B // block_b,)

    out_p = pl.pallas_call(
        _attention_kernel,
        out_shape=jax.ShapeDtypeStruct((B, Sq, Cp), x_q.dtype),
        grid_spec=pltpu.PrefetchScalarGridSpec(
            num_scalar_prefetch=0,
            grid=grid,
            in_specs=[
                pl.BlockSpec((block_b, Sk, Cin), lambda b: (b, 0, 0)),   # x_k
                pl.BlockSpec((block_b, Sq, Cin), lambda b: (b, 0, 0)),   # x_q
                pl.BlockSpec((Cin, Cp), lambda b: (0, 0)),               # Wq (scaled, bf16)
                pl.BlockSpec((1, Cp), lambda b: (0, 0)),                 # bq (scaled, f32)
                pl.BlockSpec((Cin, 2 * Cp), lambda b: (0, 0)),           # W_kv fused (bf16)
                pl.BlockSpec((1, 2 * Cp), lambda b: (0, 0)),             # b_kv fused (f32)
            ],
            out_specs=pl.BlockSpec((block_b, Sq, Cp), lambda b: (b, 0, 0)),
        ),
        compiler_params=pltpu.CompilerParams(
            dimension_semantics=("parallel",),
            vmem_limit_bytes=vmem_limit,
        ),
    )(x_k, x_q, wq_t, bq_p, wkv_t, bkv_p)

    if prepped["padded"]:
        # TODO(synk): for Cout << 128, benchmark masked stores vs this padded
        # write + host-side slice (padding writes extra HBM bytes).
        out_p = out_p[:, :, :Cout]
    return out_p


def _reference(x_k, x_q, params):
    """Pure-JAX (f32) reference mirroring the PyTorch forward."""
    wk, bk = params["l_k"]
    wq, bq = params["l_q"]
    wv, bv = params["l_v"]
    key = x_k @ wk.T + bk
    query = x_q @ wq.T + bq
    value = x_k @ wv.T + bv
    d_k = query.shape[-1]
    scores = jnp.einsum("bqd,bkd->bqk", query, key) / math.sqrt(d_k)
    p = jax.nn.softmax(scores, axis=-1)
    return jnp.einsum("bqk,bkd->bqd", p, value)


def init_params(key, in_channel, out_channel, dtype=jnp.float32):
    """Deterministic init matching nn.Linear parameter shapes."""
    ks = jax.random.split(key, 6)
    bound = 1.0 / math.sqrt(in_channel)

    def lin(kw, kb):
        w = jax.random.uniform(kw, (out_channel, in_channel), dtype, -bound, bound)
        b = jax.random.uniform(kb, (out_channel,), dtype, -bound, bound)
        return (w, b)

    return {
        "l_k": lin(ks[0], ks[1]),
        "l_q": lin(ks[2], ks[3]),
        "l_v": lin(ks[4], ks[5]),
    }


if __name__ == "__main__":
    B, Sq, Sk = 2, 8, 8
    IN_CH, OUT_CH = 32, 32

    root = jax.random.PRNGKey(0)
    k_params, k_xk, k_xq = jax.random.split(root, 3)

    params = init_params(k_params, IN_CH, OUT_CH)
    x_k = jax.random.normal(k_xk, (B, Sk, IN_CH), jnp.float32)
    x_q = jax.random.normal(k_xq, (B, Sq, IN_CH), jnp.float32)

    # One-time weight re-layout (transpose, scale fold, K|V fusion, lane pad).
    prepped = prepare_params(params)

    out = attention_forward(x_k, x_q, prepped)
    out = jax.block_until_ready(out)

    ref = _reference(x_k, x_q, params)
    assert out.shape == (B, Sq, OUT_CH)
    # Tolerance accounts for bf16 MXU operands and the approx (EUP) reciprocal.
    assert jnp.allclose(out, ref, atol=5e-2, rtol=5e-2), "mismatch vs reference"

    print("KERNEL_OK")
</pallas_src>

<mosaic_0001>
module attributes {stable_mosaic.version = 11 : i64} {
  func.func @_attention_kernel(%arg0: i32, %arg1: memref<1x8x32xf32, #tpu.memory_space<vmem>>, %arg2: memref<1x8x32xf32, #tpu.memory_space<vmem>>, %arg3: memref<32x128xbf16, #tpu.memory_space<vmem>>, %arg4: memref<1x128xf32, #tpu.memory_space<vmem>>, %arg5: memref<32x256xbf16, #tpu.memory_space<vmem>>, %arg6: memref<1x256xf32, #tpu.memory_space<vmem>>, %arg7: memref<1x8x128xf32, #tpu.memory_space<vmem>>) attributes {dimension_semantics = [#tpu.dimension_semantics<parallel>], iteration_bounds = array<i64: 2>, scalar_prefetch = 0 : i64, scratch_operands = 0 : i64, tpu.core_type = #tpu.core_type<tc>, window_params = [{transform_indices = @transform_0, window_bounds = array<i64: 1, 8, 32>}, {transform_indices = @transform_1, window_bounds = array<i64: 1, 8, 32>}, {pipeline_mode = #tpu.pipeline_mode<synchronous>, transform_indices = @transform_2, window_bounds = array<i64: 32, 128>}, {pipeline_mode = #tpu.pipeline_mode<synchronous>, transform_indices = @transform_3, window_bounds = array<i64: 1, 128>}, {pipeline_mode = #tpu.pipeline_mode<synchronous>, transform_indices = @transform_4, window_bounds = array<i64: 32, 256>}, {pipeline_mode = #tpu.pipeline_mode<synchronous>, transform_indices = @transform_5, window_bounds = array<i64: 1, 256>}, {transform_indices = @transform_6, window_bounds = array<i64: 1, 8, 128>}]} {
    %c0 = arith.constant 0 : index
    %c0_0 = arith.constant 0 : index
    %c0_1 = arith.constant 0 : index
    %0 = vector.load %arg2[%c0, %c0_0, %c0_1] : memref<1x8x32xf32, #tpu.memory_space<vmem>>, vector<1x8x32xf32>
    %1 = arith.truncf %0 : vector<1x8x32xf32> to vector<1x8x32xbf16>
    %c0_2 = arith.constant 0 : index
    %c0_3 = arith.constant 0 : index
    %c0_4 = arith.constant 0 : index
    %2 = vector.load %arg1[%c0_2, %c0_3, %c0_4] : memref<1x8x32xf32, #tpu.memory_space<vmem>>, vector<1x8x32xf32>
    %3 = arith.truncf %2 : vector<1x8x32xf32> to vector<1x8x32xbf16>
    %c0_5 = arith.constant 0 : index
    %c0_6 = arith.constant 0 : index
    %4 = vector.load %arg3[%c0_5, %c0_6] : memref<32x128xbf16, #tpu.memory_space<vmem>>, vector<32x128xbf16>
    %c0_7 = arith.constant 0 : index
    %c0_8 = arith.constant 0 : index
    %5 = vector.load %arg5[%c0_7, %c0_8] : memref<32x256xbf16, #tpu.memory_space<vmem>>, vector<32x256xbf16>
    %c0_9 = arith.constant 0 : index
    %c0_10 = arith.constant 0 : index
    %6 = vector.load %arg4[%c0_9, %c0_10] : memref<1x128xf32, #tpu.memory_space<vmem>>, vector<1x128xf32>
    %c0_11 = arith.constant 0 : index
    %c0_12 = arith.constant 0 : index
    %7 = vector.load %arg6[%c0_11, %c0_12] : memref<1x256xf32, #tpu.memory_space<vmem>>, vector<1x256xf32>
    %8 = vector.shape_cast %1 : vector<1x8x32xbf16> to vector<8x32xbf16>
    %cst = arith.constant dense<0.000000e+00> : vector<8x128xf32>
    %9 = tpu.matmul %8, %4, %cst {dimension_numbers = #tpu.dot_dimension_numbers<[1], [0], [0], [1], [0, 0, 1, 1], [], []>} : vector<8x32xbf16>, vector<32x128xbf16>, vector<8x128xf32> -> vector<8x128xf32>
    %10 = vector.broadcast %6 : vector<1x128xf32> to vector<8x128xf32>
    %11 = arith.addf %9, %10 : vector<8x128xf32>
    %12 = vector.shape_cast %11 : vector<8x128xf32> to vector<1x8x128xf32>
    %13 = vector.shape_cast %3 : vector<1x8x32xbf16> to vector<8x32xbf16>
    %cst_13 = arith.constant dense<0.000000e+00> : vector<8x256xf32>
    %14 = tpu.matmul %13, %5, %cst_13 {dimension_numbers = #tpu.dot_dimension_numbers<[1], [0], [0], [1], [0, 0, 1, 1], [], []>} : vector<8x32xbf16>, vector<32x256xbf16>, vector<8x256xf32> -> vector<8x256xf32>
    %15 = vector.broadcast %7 : vector<1x256xf32> to vector<8x256xf32>
    %16 = arith.addf %14, %15 : vector<8x256xf32>
    %17 = vector.shape_cast %16 : vector<8x256xf32> to vector<1x8x256xf32>
    %18 = vector.extract_strided_slice %17 {offsets = [0, 0, 0], sizes = [1, 8, 128], strides = [1, 1, 1]} : vector<1x8x256xf32> to vector<1x8x128xf32>
    %19 = vector.extract_strided_slice %17 {offsets = [0, 0, 128], sizes = [1, 8, 128], strides = [1, 1, 1]} : vector<1x8x256xf32> to vector<1x8x128xf32>
    %20 = arith.truncf %12 : vector<1x8x128xf32> to vector<1x8x128xbf16>
    %21 = arith.truncf %18 : vector<1x8x128xf32> to vector<1x8x128xbf16>
    %cst_14 = arith.constant dense<0.000000e+00> : vector<1x8x8xf32>
    %22 = tpu.matmul %20, %21, %cst_14 {dimension_numbers = #tpu.dot_dimension_numbers<[2], [2], [1], [1], [0, 0, 0, 1, 1, 1], [0], [0]>} : vector<1x8x128xbf16>, vector<1x8x128xbf16>, vector<1x8x8xf32> -> vector<1x8x8xf32>
    %cst_15 = arith.constant dense<0xFF800000> : vector<1x8xf32>
    %23 = vector.multi_reduction <maximumf>, %22, %cst_15 [2] : vector<1x8x8xf32> to vector<1x8xf32>
    %24 = vector.shape_cast %23 : vector<1x8xf32> to vector<1x8x1xf32>
    %25 = vector.broadcast %24 : vector<1x8x1xf32> to vector<1x8x8xf32>
    %26 = arith.subf %22, %25 : vector<1x8x8xf32>
    %27 = math.exp %26 : vector<1x8x8xf32>
    %cst_16 = arith.constant dense<0.000000e+00> : vector<1x8xf32>
    %28 = vector.multi_reduction <add>, %27, %cst_16 [2] : vector<1x8x8xf32> to vector<1x8xf32>
    %29 = vector.shape_cast %28 : vector<1x8xf32> to vector<1x8x1xf32>
    %30 = arith.truncf %27 : vector<1x8x8xf32> to vector<1x8x8xbf16>
    %31 = arith.truncf %19 : vector<1x8x128xf32> to vector<1x8x128xbf16>
    %cst_17 = arith.constant dense<0.000000e+00> : vector<1x8x128xf32>
    %32 = tpu.matmul %30, %31, %cst_17 {dimension_numbers = #tpu.dot_dimension_numbers<[2], [1], [1], [2], [0, 0, 0, 1, 1, 2], [0], [0]>} : vector<1x8x8xbf16>, vector<1x8x128xbf16>, vector<1x8x128xf32> -> vector<1x8x128xf32>
    %33 = tpu.reciprocal %29 {approx = true} : vector<1x8x1xf32> -> vector<1x8x1xf32>
    %34 = vector.broadcast %33 : vector<1x8x1xf32> to vector<1x8x128xf32>
    %35 = arith.mulf %32, %34 : vector<1x8x128xf32>
    %c0_18 = arith.constant 0 : index
    %c0_19 = arith.constant 0 : index
    %c0_20 = arith.constant 0 : index
    %36 = vector.load %arg7[%c0_18, %c0_19, %c0_20] : memref<1x8x128xf32, #tpu.memory_space<vmem>>, vector<1x8x128xf32>
    tpu.vector_store %arg7[%c0_18, %c0_19, %c0_20], %35 {strides = array<i32>} : memref<1x8x128xf32, #tpu.memory_space<vmem>>, vector<1x8x128xf32>,
    return
  }
  func.func @transform_0(%arg0: i32) -> (i32, i32, i32) {
    %c0_i32 = arith.constant 0 : i32
    %c0_i32_0 = arith.constant 0 : i32
    %c0_i32_1 = arith.constant 0 : i32
    return %arg0, %c0_i32, %c0_i32_0 : i32, i32, i32
  }
  func.func @transform_1(%arg0: i32) -> (i32, i32, i32) {
    %c0_i32 = arith.constant 0 : i32
    %c0_i32_0 = arith.constant 0 : i32
    %c0_i32_1 = arith.constant 0 : i32
    return %arg0, %c0_i32, %c0_i32_0 : i32, i32, i32
  }
  func.func @transform_2(%arg0: i32) -> (i32, i32) {
    %c0_i32 = arith.constant 0 : i32
    %c0_i32_0 = arith.constant 0 : i32
    %c0_i32_1 = arith.constant 0 : i32
    return %c0_i32, %c0_i32_0 : i32, i32
  }
  func.func @transform_3(%arg0: i32) -> (i32, i32) {
    %c0_i32 = arith.constant 0 : i32
    %c0_i32_0 = arith.constant 0 : i32
    %c0_i32_1 = arith.constant 0 : i32
    return %c0_i32, %c0_i32_0 : i32, i32
  }
  func.func @transform_4(%arg0: i32) -> (i32, i32) {
    %c0_i32 = arith.constant 0 : i32
    %c0_i32_0 = arith.constant 0 : i32
    %c0_i32_1 = arith.constant 0 : i32
    return %c0_i32, %c0_i32_0 : i32, i32
  }
  func.func @transform_5(%arg0: i32) -> (i32, i32) {
    %c0_i32 = arith.constant 0 : i32
    %c0_i32_0 = arith.constant 0 : i32
    %c0_i32_1 = arith.constant 0 : i32
    return %c0_i32, %c0_i32_0 : i32, i32
  }
  func.func @transform_6(%arg0: i32) -> (i32, i32, i32) {
    %c0_i32 = arith.constant 0 : i32
    %c0_i32_0 = arith.constant 0 : i32
    %c0_i32_1 = arith.constant 0 : i32
    return %arg0, %c0_i32, %c0_i32_0 : i32, i32, i32
  }
}

</mosaic_0001>

<bundles_post_ra>
// kernel: tpu_custom_call.1
= control target key start
LH: loop header
LB: loop body
LE: loop exit
PB: predicated region body
PF: predicated region fallthrough
CT: control target
= control target key end

     0   :  { %s1388_s0 = inlined_call_operand.hbm [shape: f32[2,8,32], index: 0, kind: input, shape index: {}]   ;;  %s1389_s1 = inlined_call_operand.hbm [shape: f32[2,8,32], index: 1, kind: input, shape index: {}]   ;;  %s1390_s2 = inlined_call_operand.hbm [shape: bf16[32,128], index: 2, kind: input, shape index: {}]   ;;  %s1391_s3 = inlined_call_operand.vmem [shape: f32[1,128], index: 3, kind: input, shape index: {}]   ;;  %s1392_s4 = inlined_call_operand.hbm [shape: bf16[32,256], index: 4, kind: input, shape index: {}]   ;;  %s1393_s5 = inlined_call_operand.vmem [shape: f32[1,256], index: 5, kind: input, shape index: {}]   ;;  %s1394_s6 = inlined_call_operand.hbm [shape: f32[2,8,128], index: 6, kind: output, shape index: {}]  }
   0x1   :  { %1399 = sst [smem:[#allocation17_spill]] %s1390_s2 }
   0x2   :  { %1400 = sst [smem:[#allocation18_spill]] %s1392_s4 }
   0x3   :  { %11 = vsyncpa [#allocation3], 0 }
   0x4   :  { %13 = vsyncpa [#allocation3 + $0x1], 0 }
   0x5   :  { %14 = vsyncpa [#allocation6], 0 }
   0x6   :  { %16 = vsyncpa [#allocation6 + $0x1], 0 }
   0x7   :  { %17 = vsyncpa [#allocation9], 0 }
   0x8   :  { %18 = vsyncpa [#allocation4], 0 }
   0x9   :  { %20 = vsyncpa [#allocation4 + $0x1], 0  ;;  %s1105_s21 = smov 0   ;;  %s1107_s22 = smov 0  }
   0xa   :  { %s1109_s23 = smov 0   ;;  %s1111_s24 = smov 0  }
   0xb LB: > { %s1126_s25 = sadd.s32 4294967295, %s1056_s24   ;;  %s715_s26 = sadd.s32 4294967294, %s1056_s24   ;;  %s1056_s24 = sphi %s1111_s24, %s1424_s24   ;;  %s1052_s23 = sphi %s1109_s23, %s1423_s23   ;;  %s1048_s22 = sphi %s1107_s22, %s1422_s22   ;;  %s1044_s21 = sphi %s1105_s21, %s1421_s21  }
   0xc   : > { %p46_p0 = scmp.ne.s32.totalorder %s1048_s22, %s1044_s21  ;;  %p1395_p1 = scmp.eq.s32.totalorder %s1126_s25, 0 }
   0xd   : > { %p186_p3 = scmp.eq.s32.totalorder %s715_s26, 1  ;;  %p716_p5 = scmp.ge.s32.totalorder %s1056_s24, 1 }
   0xe   : > { %p1135_p4 = por %p1395_p1, %p46_p0  ;;  %p193_p7 = scmp.lt.s32.totalorder %s1056_s24, 3 }
   0xf   : > { %p1140_p6 = por %p186_p3, %p46_p0  ;;  %s1058_s30 = smov [#allocation7]  }
  0x10   : > { %s1401_s27 = scalar_select %p1135_p4, 1, 0 }
  0x11   : > { %s1402_s28 = scalar_select %p1140_p6, 1, 0 }
  0x12   : > { %p1145_p8 = pnand %p716_p5, %p193_p7  ;;  %s205_s7 = sshll.u32 %s1058_s30, 4  ;;  %s1149_s7 = int_to_ptr.vmem [resolvable:$true] %s205_s7 }
  0x13   : > { %s1059_s9 = smov [#allocation8]   ;;  %s1405_s2 = sld [smem:[#allocation17_spill]] }
  0x14   : > { %s1403_s29 = scalar_select %p1145_p8, 1, 0 }
  0x15   : > { %p785_p9 = pneg %p1145_p8  ;;  %s221_s10 = sshll.u32 %s1059_s9, 4  ;;  %s1160_s10 = int_to_ptr.vmem [resolvable:$true] %s221_s10 }
  0x17   : > { %p1156_p11 = pnand %p785_p9, %p1395_p1 }
  0x19   : > { %s862_s13 = scalar_lea.hbm %s1405_s2, 256  ;;  %p864_p13 = pneg %p1156_p11 }
  0x1a   : > { %p863_p12 = scmp.ne.s32.totalorder %s1405_s2, %s862_s13  ;;  %p869_p5 = scmp.lt.u32.totalorder %s862_s13, %s1405_s2 }
  0x1c   : > { %p865_p0 = pnand %p864_p13, %p863_p12 }
  0x1e   : > { %p866_p3 = pneg %p865_p0 }
  0x20   : > { %p871_p7 = pnand %p869_p5, %p866_p3 }
  0x22   : > { %874 = shalt.err (!%p871_p7)
}
  0x23   : > { %s875_s18 = scalar_lea.vmem %s1149_s7, 256  ;;  %p883_p2 = scmp.lt.s32.totalorder %s1149_s7, %s1149_s7 }
  0x24   : > { %p876_p9 = scmp.ne.s32.totalorder %s1149_s7, %s875_s18  ;;  %p884_p12 = scmp.lt.s32.totalorder %s875_s18, %s875_s18 }
  0x26   : > { %p878_p10 = pnand %p876_p9, %p864_p13  ;;  %p885_p0 = por %p884_p12, %p883_p2 }
  0x28   : > { %p879_p1 = pneg %p878_p10 }
  0x2a   : > { %p886_p6 = pnand %p885_p0, %p879_p1 }
  0x2c   : > { %889 = shalt.err (!%p886_p6)
}
  0x2d   : > { %s1060_s19 = smov 64   ;;  %s1061_s20 = smov 4  }
  0x2e   : > { %788 = dma.hbm_to_vmem [thread:$0]  (!%p1156_p11), %s1405_s2, 256, %s1149_s7, [#allocation6], %s1060_s19, %s1060_s19, %s1061_s20  }
  0x2f   : > { %s1406_s4 = sld [smem:[#allocation18_spill]] }
  0x35   : > { %s890_s12 = scalar_lea.hbm %s1406_s4, 512 }
  0x36   : > { %p891_p2 = scmp.ne.s32.totalorder %s1406_s4, %s890_s12  ;;  %p897_p10 = scmp.lt.u32.totalorder %s890_s12, %s1406_s4 }
  0x38   : > { %p893_p1 = pnand %p891_p2, %p864_p13 }
  0x3a   : > { %p894_p6 = pneg %p893_p1 }
  0x3c   : > { %p899_p3 = pnand %p897_p10, %p894_p6 }
  0x3e   : > { %902 = shalt.err (!%p899_p3)
}
  0x3f   : > { %s903_s7 = scalar_lea.vmem %s1160_s10, 512  ;;  %p911_p12 = scmp.lt.s32.totalorder %s1160_s10, %s1160_s10 }
  0x40   : > { %p904_p5 = scmp.ne.s32.totalorder %s1160_s10, %s903_s7  ;;  %p912_p0 = scmp.lt.s32.totalorder %s903_s7, %s903_s7 }
  0x42   : > { %p906_p7 = pnand %p904_p5, %p864_p13  ;;  %p913_p2 = por %p912_p0, %p911_p12 }
  0x44   : > { %p907_p9 = pneg %p906_p7 }
  0x46   : > { %p914_p1 = pnand %p913_p2, %p907_p9 }
  0x48   : > { %917 = shalt.err (!%p914_p1)
}
  0x49   : > { %s1062_s17 = smov 128   ;;  %s1063_s18 = smov 8  }
  0x4a   : > { %791 = dma.hbm_to_vmem [thread:$0]  (!%p1156_p11), %s1406_s4, 512, %s1160_s10, [#allocation9], %s1062_s17, %s1062_s17, %s1063_s18  }
  0x4b   : > { %s1215_s26 = sadd.s32 1, %s1056_s24   ;;  %s33_s9 = sadd.s32 1, %s1052_s23 }
  0x4c   : > { %s30_s30 = ssub.s32 %s1056_s24, %s1215_s26  ;;  %p40_p6 = scmp.ne.s32.totalorder %s1052_s23, %s1048_s22 }
  0x4d   : > { %p31_p13 = scmp.eq.s32.totalorder %s30_s30, 0  ;;  %p41_p10 = scmp.eq.s32.totalorder %s1056_s24, 0 }
  0x4e   : > { %p1408_p5 = scmp.eq.s32.totalorder %s1126_s25, 1  ;;  %p805_p9 = scmp.lt.s32.totalorder %s1056_s24, 2 }
  0x4f   : > { %s1224_s11 = scalar_select %p31_p13, %s1052_s23, %s33_s9  }
  0x50   : > { %p42_p3 = por %p41_p10, %p40_p6  ;;  %p1228_p7 = por %p1408_p5, %p40_p6 }
  0x51   : > { %1407 = sst [smem:[#allocation16_spill]] %s1224_s11  ;;  %s238_s8 = sand.u32 1, %s1052_s23  }
  0x52   : > { %s1409_s12 = scalar_select %p1228_p7, 1, 0 }
  0x53   : > { %s1234_s10 = sshll.u32 %s238_s8, 3  ;;  %s721_s13 = sshll.u32 %s1056_s24, 7 }
  0x54   : > { %s1240_s16 = scalar_lea.hbm %s1388_s0, %s721_s13  ;;  %s242_s7 = scalar_lea.vmem [#allocation2], %s1234_s10 }
  0x55   : > { %s249_s17 = sshll.u32 %s242_s7, 4  ;;  %p1245_p11 = pnand %p805_p9, %p42_p3  ;;  %s1243_s17 = int_to_ptr.vmem [resolvable:$true] %s249_s17 }
  0x56   : > { %s1252_s30 = scalar_lea.hbm %s1389_s1, %s721_s13  ;;  %s256_s9 = sand.u32 1, %s1056_s24  }
  0x57   : > { %s239_s14 = scalar_lea.sflag [#allocation3], %s238_s8  ;;  %s918_s15 = scalar_lea.hbm %s1240_s16, 128 }
  0x58   : > { %p919_p12 = scmp.ne.s32.totalorder %s1240_s16, %s918_s15  ;;  %p920_p0 = pneg %p1245_p11 }
  0x59   : > { %s923_s4 = scalar_lea.hbm %s1388_s0, 256  ;;  %p924_p13 = scmp.lt.u32.totalorder %s1240_s16, %s1388_s0 }
  0x5a   : > { %p921_p2 = pnand %p920_p0, %p919_p12  ;;  %p925_p6 = scmp.lt.u32.totalorder %s923_s4, %s918_s15 }
  0x5b   : > { %p927_p3 = scmp.lt.u32.totalorder %s918_s15, %s1240_s16 }
  0x5c   : > { %p922_p1 = pneg %p921_p2  ;;  %p926_p10 = por %p925_p6, %p924_p13 }
  0x5e   : > { %p928_p5 = por %p927_p3, %p926_p10 }
  0x60   : > { %p929_p9 = pnand %p928_p5, %p922_p1 }
  0x62   : > { %932 = shalt.err (!%p929_p9)
}
  0x63   : > { %s933_s8 = scalar_lea.vmem %s1243_s17, 128  ;;  %s1064_s2 = smov [#allocation2]  }
  0x64   : > { %p934_p12 = scmp.ne.s32.totalorder %s1243_s17, %s933_s8  ;;  %s938_s13 = sshll.u32 %s1064_s2, 4  ;;  %s939_s13 = int_to_ptr.vmem [resolvable:$false] %s938_s13 }
  0x65   : > { %s940_s11 = scalar_lea.vmem %s939_s13, 256  ;;  %p941_p4 = scmp.lt.s32.totalorder %s1243_s17, %s939_s13 }
  0x66   : > { %p936_p2 = pnand %p934_p12, %p920_p0  ;;  %p942_p13 = scmp.lt.s32.totalorder %s940_s11, %s933_s8 }
  0x68   : > { %p937_p7 = pneg %p936_p2  ;;  %p943_p6 = por %p942_p13, %p941_p4 }
  0x6a   : > { %p944_p10 = pnand %p943_p6, %p937_p7 }
  0x6c   : > { %947 = shalt.err (!%p944_p10)
}
  0x6d   : > { %795 = dma.hbm_to_vmem [thread:$0]  (!%p1245_p11), %s1240_s16, 128, %s1243_s17, %s239_s14  }
  0x6e   : > { %s260_s4 = scalar_lea.vmem [#allocation5], %s1234_s10  ;;  %s257_s15 = scalar_lea.sflag [#allocation6], %s256_s9 }
  0x6f   : > { %s267_s20 = sshll.u32 %s260_s4, 4  ;;  %s948_s7 = scalar_lea.hbm %s1252_s30, 128  ;;  %s268_s20 = int_to_ptr.vmem [resolvable:$true] %s267_s20 }
  0x70   : > { %p949_p4 = scmp.ne.s32.totalorder %s1252_s30, %s948_s7  ;;  %s953_s2 = scalar_lea.hbm %s1389_s1, 256 }
  0x71   : > { %p954_p3 = scmp.lt.u32.totalorder %s1252_s30, %s1389_s1  ;;  %p955_p5 = scmp.lt.u32.totalorder %s953_s2, %s948_s7 }
  0x72   : > { %p951_p7 = pnand %p949_p4, %p920_p0  ;;  %p957_p12 = scmp.lt.u32.totalorder %s948_s7, %s1252_s30 }
  0x73   : > { %p956_p9 = por %p955_p5, %p954_p3 }
  0x74   : > { %p952_p1 = pneg %p951_p7 }
  0x75   : > { %p958_p2 = por %p957_p12, %p956_p9 }
  0x77   : > { %p959_p13 = pnand %p958_p2, %p952_p1 }
  0x79   : > { %962 = shalt.err (!%p959_p13)
}
  0x7a   : > { %s963_s10 = scalar_lea.vmem %s268_s20, 128  ;;  %s1065_s16 = smov [#allocation5]  }
  0x7b   : > { %p964_p6 = scmp.ne.s32.totalorder %s268_s20, %s963_s10  ;;  %s968_s17 = sshll.u32 %s1065_s16, 4  ;;  %s969_s17 = int_to_ptr.vmem [resolvable:$false] %s968_s17 }
  0x7c   : > { %s970_s9 = scalar_lea.vmem %s969_s17, 256  ;;  %p971_p7 = scmp.lt.s32.totalorder %s268_s20, %s969_s17 }
  0x7d   : > { %p966_p10 = pnand %p964_p6, %p920_p0  ;;  %p972_p8 = scmp.lt.s32.totalorder %s970_s9, %s963_s10 }
  0x7f   : > { %p967_p4 = pneg %p966_p10  ;;  %p973_p3 = por %p972_p8, %p971_p7 }
  0x81   : > { %p974_p5 = pnand %p973_p3, %p967_p4 }
  0x83   : > { %977 = shalt.err (!%p974_p5)
}
  0x84   : > { %798 = dma.hbm_to_vmem [thread:$0]  (!%p1245_p11), %s1252_s30, 128, %s268_s20, %s257_s15  }
  0x85   : > { %p1411_p1 = scmp.ne.s32.totalorder %s1403_s29, 0 }
  0x86   : > { %s1305_s14 = sand.u32 (!%p1411_p1), 1, %s1048_s22   ;;  %p1412_p8 = scmp.ne.s32.totalorder (!%p1411_p1), %s1401_s27, 0 }
  0x87   : > { %276 = sbr.rel (%p1411_p1) target bundleno = 986 (0x3da), region = 44  ;;  %s1308_s4 = sshll.u32 (!%p1411_p1), %s1305_s14, 3 }
  0x88   : > { %s279_s7 = scalar_lea.sflag (!%p1411_p1), [#allocation3], %s1305_s14  ;;  %s282_s19 = scalar_lea.vmem (!%p1411_p1), [#allocation2], %s1308_s4 }
  0x8e   : > { %1023 = dma.done.wait (%p1412_p8), %s279_s7, 128  }
  0x8f   : > { %1025 = vsyncadd (%p1412_p8), %s279_s7, 4294967168  ;;  %s287_s29 = sand.u32 1, %s1126_s25   ;;  %s291_s30 = scalar_lea.vmem [#allocation5], %s1308_s4 }
  0x90   : > { %s288_s18 = scalar_lea.sflag [#allocation6], %s287_s29 }
  0x91   : > { %1027 = dma.done.wait (%p1412_p8), %s288_s18, 128  }
  0x92   : > { %1029 = vsyncadd (%p1412_p8), %s288_s18, 4294967168  ;;  %p1413_p11 = scmp.eq.s32.totalorder %s1126_s25, 0 }
  0x94   : > { %1031 = dma.done.wait (%p1413_p11), [#allocation6], 256   ;;  %p1414_p0 = pmov %p1413_p11 }
  0x96   : > { %1033 = vsyncadd (%p1414_p0), [#allocation6], 4294967040  ;;  %p1415_p9 = pmov %p1414_p0 }
  0x97   : > { %p1416_p12 = pmov %p1414_p0 }
  0x98   : > { %1035 = dma.done.wait (%p1415_p9), [#allocation9], 512  }
  0x99   : > { %1037 = vsyncadd (%p1416_p12), [#allocation9], 4294966784  ;;  %v1066_v0 = vmov 0.0   ;;  %v1067_v1 = vmov 0   ;;  %vm1068_vm0 = vmmov 0   ;;  %v856_v6 = vld [vmem:[#allocation7] sm:$0xff]   ;;  %v411_v12 = vlaneseq }
  0x9a   : > { %751 = vmatprep.subr.bf16.mxu0 %v1066_v0  ;;  %476 = vmatprep.mubr.bf16.mxu1 %v1067_v1  ;;  %v850_v2 = vld [vmem:[#allocation8 + $0x4] ss:$8 sps:$4 sm:$0xff]   ;;  %v852_v3 = vld [vmem:[#allocation8] ss:$8 sps:$4 sm:$0xff]   ;;  %v853_v4 = vld [vmem:[#allocation8 + $0x14] ss:$8 sps:$4 sm:$0xff]  }
  0x9b   : > { %755 = vmatprep.mubr.msk.bf16.mxu0 %vm1068_vm0, %v1066_v0  ;;  %444 = vmatprep.subr.bf16.mxu1 %v850_v2  ;;  %v855_v5 = vld [vmem:[#allocation8 + $0x10] ss:$8 sps:$4 sm:$0xff]   ;;  %v334_v9 = vld [vmem:[%s291_s30] sm:$0xff]  ;;  %vm366_vm1 = vcmask 261120   ;;  %v412_v13 = vshrl.u32 %v411_v12, 7  ;;  %vm542_vm2 = vcmask 1043456  }
  0x9c   : > { %445 = vmatpush1.bf16.msra.mxu1 %v852_v3  ;;  %v336_v7 = vld [vmem:[%s282_s19] sm:$0xff]  ;;  %752 = vmatpush3.bf16.msra.mxu0 %v856_v6  ;;  %v335_v11 = vpack.c.bf16 %v334_v9, %v334_v9  ;;  %vm527_vm3 = vcmask 64512   ;;  %s741_s2 = sshll.u32 %s1126_s25, 7  ;;  %s332_s13 = scalar_lea.vmem [#allocation10], %s1308_s4 }
  0x9d   : > { %446 = vmatprep.subr.bf16.mxu1 %v853_v4  ;;  %v857_v8 = vld [vmem:[#allocation7 + $0x8] sm:$0xff]   ;;  %v337_v10 = vpack.c.bf16 %v336_v7, %v336_v7  ;;  %753 = vmatprep.subr.bf16.mxu0 %v1066_v0  ;;  %v413_v14 = vsub.s32 0, %v412_v13  ;;  %v347_v15 = vld [vmem:[%s1393_s5] sm:$0x3]  ;;  %v417_v16 = vsub.s32 1, %v412_v13  ;;  %s603_s11 = sshll.u32 %s332_s13, 4  ;;  %s1344_s17 = scalar_lea.hbm %s1394_s6, %s741_s2  ;;  %s1346_s11 = int_to_ptr.vmem [resolvable:$true] %s603_s11 }
  0x9e   : > { %v730_v22 = vld [vmem:[%s1391_s3] ss:$0 sm:$0xff]  ;;  %s590_s25 = scalar_lea.sflag [#allocation4], %s1305_s14  ;;  %s978_s9 = scalar_lea.vmem %s1346_s11, 128 }
  0x9f   : > { %v414_v17 = vrot.slane %v347_v15, %v413_v14  ;;  %v418_v18 = vrot.slane %v347_v15, %v417_v16  ;;  %p979_p2 = scmp.ne.s32.totalorder %s1346_s11, %s978_s9  ;;  %p1417_p13 = scmp.ne.s32.totalorder %s1409_s12, 0 }
  0xa0   : > { %447 = vmatpush1.bf16.msra.mxu1 %v855_v5  ;;  %754 = vmatpush3.bf16.msra.mxu0 %v857_v8  ;;  %s1069_s4 = smov [#allocation10]  }
  0xa1   : > { %765 = vmatprep.subr.bf16.mxu1 %v1066_v0  ;;  %759 = vmatprep.subr.bf16.mxu0 %v1066_v0  ;;  %p980_p6 = pnand %p979_p2, %p1417_p13  ;;  %s982_s7 = sshll.u32 %s1069_s4, 4  ;;  %s983_s7 = int_to_ptr.vmem [resolvable:$false] %s982_s7 }
  0xa2   : > { %s984_s19 = scalar_lea.vmem %s983_s7, 256  ;;  %p985_p4 = scmp.lt.s32.totalorder %s1346_s11, %s983_s7 }
  0xa3   : > { %738 = vmatmul.mubr.msk.bf16.vlgmr.msra.gmra.mrb[0].mxu1 %vm366_vm1, %v337_v10  ;;  %756 = vmatmul.mubr.msk.bf16.vlgmr.msra.gmra.mrb[0].mxu0 %vm366_vm1, %v335_v11  ;;  %p981_p10 = pneg %p980_p6  ;;  %p986_p7 = scmp.lt.s32.totalorder %s984_s19, %s978_s9 }
  0xa4   : > { %767 = vmatprep.mubr.msk.bf16.mxu1 %vm1068_vm0, %v1066_v0  ;;  %761 = vmatprep.mubr.msk.bf16.mxu0 %vm1068_vm0, %v1066_v0 }
  0xa5   : > { %p987_p3 = por %p986_p7, %p985_p4 }
  0xa7   : > { %p988_p5 = pnand %p987_p3, %p981_p10 }
 0x176   : > { %v478_v19 = vpop.f32.mrb[0].mxu1  ;;  %v404_v25 = vpop.f32.mrb[0].mxu0 }
 0x177   : > { %v479_v20 = vadd.f32 %v478_v19, %v414_v17  ;;  %v480_v21 = vpop.f32.mrb[1].mxu1  ;;  %v757_v28 = vpop.f32.mrb[1].mxu0  ;;  %v405_v30 = vadd.f32 %v730_v22, %v404_v25 }
 0x178   : > { %v481_v23 = vadd.f32 %v480_v21, %v418_v18  ;;  %v482_v24 = vpop.f32.mrb[2].mxu1  ;;  %v407_v31 = vpop.f32.mrb[2].mxu0 }
 0x179   : > { %v486_v26 = vpack.c.bf16 %v479_v20, %v479_v20  ;;  %v483_v27 = vpop.f32.mrb[3].mxu1  ;;  %v758_v32 = vpop.f32.mrb[3].mxu0  ;;  %v485_v34 = vpack.c.bf16 %v405_v30, %v405_v30 }
 0x17a   : > { %v538_v29 = vpack.c.bf16 %v481_v23, %v481_v23 }
 0x17b   : > { %760 = vmatpush3.bf16.xpose.msra.mxu0 %v486_v26 }
 0x17c   : > { %v544_v33 = vsel %vm542_vm2, %v538_v29, 0 }
 0x17d   : > { %766 = vmatpush3.bf16.msra.mxu1 %v544_v33 }
 0x182   : > { %762 = vmatmul.mubr.bf16.vlgmr.msra.gmra.mrb[4].mxu0 %v485_v34 }
 0x255   : > { %v521_v35 = vpop.f32.mrb[4].mxu0 }
 0x256   : > { %v763_v36 = vpop.f32.mrb[5].mxu0  ;;  %v528_v37 = vsel %vm527_vm3, %v521_v35, -inf }
 0x257   : > { %529 = vmax.xlane.f32.xlu0 %v528_v37  ;;  %v524_v38 = vpop.f32.mrb[6].mxu0 }
 0x258   : > { %v764_v39 = vpop.f32.mrb[7].mxu0 }
 0x2e4   : > { %v530_v40 = vpop.xlane.xlu0 %529 }
 0x2e5   : > { %v531_v41 = vsub.f32 %v521_v35, %v530_v40 }
 0x2e7   : > { %v532_v42 = vmul.f32 1.442695, %v531_v41 }
 0x2e9   : > { %858 = vpow2.f32 %v532_v42 }
 0x2f3   : > { %v859_v43 = vpop.eup %858 }
 0x2f4   : > { %v534_v44 = vsel %vm527_vm3, %v859_v43, 0.0  ;;  %v537_v45 = vpack.c.bf16 %v859_v43, %v859_v43 }
 0x2f5   : > { %535 = vadd.xlane.f32.xlu0 %v534_v44 }
 0x2f6   : > { %768 = vmatmul.mubr.msk.bf16.vlgmr.msra.gmra.mrb[4].mxu1 %vm527_vm3, %v537_v45 }
 0x382   : > { %v536_v46 = vpop.xlane.xlu0 %535 }
 0x383   : > { %860 = vrcp.f32 %v536_v46 }
 0x38d   : > { %v861_v47 = vpop.eup %860 }
 0x3c9   : > { %v580_v48 = vpop.f32.mrb[4].mxu1 }
 0x3ca   : > { %v587_v49 = vmul.f32 %v861_v47, %v580_v48  ;;  %v769_v50 = vpop.f32.mrb[5].mxu1 }
 0x3cb   : > { %v583_v51 = vpop.f32.mrb[6].mxu1 }
 0x3cc   : > { %588 = vst [vmem:[%s332_s13] sm:$0xff] %v587_v49  ;;  %v770_v52 = vpop.f32.mrb[7].mxu1 }
 0x3cd   : > { %991 = shalt.err (!%p988_p5)
}
 0x3ce   : > { %s992_s14 = scalar_lea.hbm %s1344_s17, 128  ;;  %s996_s30 = scalar_lea.hbm %s1394_s6, 256 }
 0x3cf   : > { %p993_p1 = scmp.ne.s32.totalorder %s1344_s17, %s992_s14  ;;  %p997_p0 = scmp.lt.u32.totalorder %s1344_s17, %s1394_s6 }
 0x3d0   : > { %p998_p9 = scmp.lt.u32.totalorder %s996_s30, %s992_s14  ;;  %p1000_p2 = scmp.lt.u32.totalorder %s992_s14, %s1344_s17 }
 0x3d1   : > { %p994_p8 = pnand %p993_p1, %p1417_p13 }
 0x3d2   : > { %p999_p12 = por %p998_p9, %p997_p0 }
 0x3d3   : > { %p995_p11 = pneg %p994_p8 }
 0x3d4   : > { %p1001_p6 = por %p1000_p2, %p999_p12 }
 0x3d6   : > { %p1002_p10 = pnand %p1001_p6, %p995_p11 }
 0x3d8   : > { %1005 = shalt.err (!%p1002_p10)
}
 0x3d9   : > { %783 = dma.vmem_to_hbm [thread:$0]  (%p1417_p13), %s1346_s11, 128, %s1344_s17, %s590_s25  }
 0x3da PF: > { %s615_s15 = sand.u32 1, %s1044_s21   ;;  %p1418_p4 = scmp.ne.s32.totalorder %s1402_s28, 0 }
 0x3db   : > { %p1419_p7 = scmp.ge.s32.totalorder %s1056_s24, 2  ;;  %s616_s8 = scalar_lea.sflag [#allocation4], %s615_s15 }
 0x3dd   : > { %p800_p3 = pnand %p1419_p7, %p1418_p4 }
 0x3df   : > { %1039 = dma.done.wait (!%p800_p3), %s616_s8, 128  }
 0x3e0   : > { %1041 = vsyncadd (!%p800_p3), %s616_s8, 4294967168  ;;  %s1420_s2 = sld [smem:[#allocation16_spill]]  ;;  %p23_p5 = scmp.ge.s32.totalorder %s1215_s26, 4  }
 0x3e1   : > { %s1421_s21 = smov %s1048_s22  ;;  %s1422_s22 = smov %s1052_s23 }
 0x3e2   : > { %s1424_s24 = smov %s1215_s26  ;;  %25 = sbr.rel (!%p23_p5) target bundleno = 11 (0xb), region = 110 }
 0x3e6   : > { %s1423_s23 = smov %s1420_s2 }
 0x3e9   :  { %621 = vsyncpa [#allocation3], 1 }
 0x3ea   :  { %623 = vsyncpa [#allocation3 + $0x1], 1 }
 0x3eb   :  { %624 = vsyncpa [#allocation6], 1 }
 0x3ec   :  { %626 = vsyncpa [#allocation6 + $0x1], 1 }
 0x3ed   :  { %627 = vsyncpa [#allocation9], 1 }
 0x3ee   :  { %628 = vsyncpa [#allocation4], 1 }
 0x3ef   :  { %630 = vsyncpa [#allocation4 + $0x1], 1 }

</bundles_post_ra>
